<compile_context>
chip_gen: v5e
topology: v5e:2x2
jax: 0.10.0
libtpu: 0.0.40
codegen_flags: <defaults>
</compile_context>

<pallas_src>
import math

import jax
import jax.numpy as jnp
from jax.experimental import pallas as pl
from jax.experimental.pallas import tpu as pltpu

BF16 = jnp.bfloat16
RMS_EPS = 1e-5
ROPE_THETA = 1e6


def _query_vmem_cap():
    """Physical per-core VMEM capacity (bytes); conservative fallback if unknown."""
    try:
        return int(pltpu.get_tpu_info().vmem_capacity_bytes)
    except Exception:
        return 64 * 1024 * 1024          # assume v7x-like (smallest) budget when unknown


_VMEM_CAP = _query_vmem_cap()
_BIG_VMEM = _VMEM_CAP >= (100 << 20)                       # v5e / v6e have 128 MiB per core
# leave >= 24 MiB headroom for compiler-internal scratch (v7x only has 64 MiB / core)
VMEM_LIMIT = min(64 << 20, max(32 << 20, _VMEM_CAP - (24 << 20)))
_SEQ_TILES = (512, 256, 128) if _BIG_VMEM else (256, 128)
_MOE_F_TILES = (512, 256, 128) if _BIG_VMEM else (256, 128)


def _cparams(dims):
    return pltpu.CompilerParams(dimension_semantics=dims,
                                vmem_limit_bytes=VMEM_LIMIT)


def _pick(dim, candidates=(512, 256, 128)):
    """Largest MXU/lane-friendly tile that divides `dim`, else the full dim."""
    for c in candidates:
        if dim >= c and dim % c == 0:
            return c
    return dim


# ------------------- kernel 1: RMSNorm + fused QKV projection + RoPE -------------------

def qkv_rope_kernel(x_ref, g_ref, w_ref, cos_ref, sin_ref,
                    q_ref, k_ref, v_ref, xn_ref):
    h = pl.program_id(2)

    @pl.when(h == 0)  # normalize the token tile once, reuse for every head
    def _():
        x = x_ref[0].astype(jnp.float32)                              # [ts, Dm]
        var = jnp.mean(x * x, axis=-1, keepdims=True)
        xn = x * jax.lax.rsqrt(var + RMS_EPS) * g_ref[...].astype(jnp.float32)
        xn_ref[...] = xn.astype(xn_ref.dtype)

    xn = xn_ref[...]
    # fused per-head QKV projection: one N = 3*D matmul instead of three N = D
    qkv = jnp.dot(xn, w_ref[0], preferred_element_type=jnp.float32)   # [ts, 3D]

    D = q_ref.shape[-1]
    half = D // 2
    q = qkv[:, :D]
    k = qkv[:, D:2 * D]
    v = qkv[:, 2 * D:]
    cos = cos_ref[...]
    sin = sin_ref[...]            # first half pre-negated: rotate_half == lane-rotation * sin

    def rope(t):
        rot = jnp.concatenate([t[:, half:], t[:, :half]], axis=-1)
        return t * cos + rot * sin

    scale = 1.0 / math.sqrt(D)                      # fold attention scale into q
    q_ref[0, 0] = (rope(q) * scale).astype(q_ref.dtype)
    k_ref[0, 0] = rope(k).astype(k_ref.dtype)
    v_ref[0, 0] = v.astype(v_ref.dtype)


def _qkv_rope(x_bsd, g, wqkv, cos, sin):
    B, S, Dm = x_bsd.shape
    H = wqkv.shape[0]
    D = wqkv.shape[-1] // 3
    ts = _pick(S, (512, 256, 128))
    out_sd = jax.ShapeDtypeStruct((B, H, S, D), x_bsd.dtype)
    o_spec = pl.BlockSpec((1, 1, ts, D), lambda b, s, h: (b, h, s, 0))
    return pl.pallas_call(
        qkv_rope_kernel,
        out_shape=(out_sd, out_sd, out_sd),
        grid=(B, S // ts, H),
        in_specs=[
            pl.BlockSpec((1, ts, Dm), lambda b, s, h: (b, s, 0)),
            pl.BlockSpec((1, Dm), lambda b, s, h: (0, 0)),
            pl.BlockSpec((1, Dm, 3 * D), lambda b, s, h: (h, 0, 0)),
            pl.BlockSpec((ts, D), lambda b, s, h: (s, 0)),
            pl.BlockSpec((ts, D), lambda b, s, h: (s, 0)),
        ],
        out_specs=(o_spec, o_spec, o_spec),
        scratch_shapes=[pltpu.VMEM((ts, Dm), x_bsd.dtype)],
        compiler_params=_cparams(("parallel", "parallel", "arbitrary")),
    )(x_bsd, g, wqkv, cos, sin)


# ------------------- kernel 2: flash-style causal attention ----------------------

def flash_attn_kernel(q_ref, k_ref, v_ref, o_ref, m_ref, l_ref, acc_ref):
    qi = pl.program_id(2)
    ki = pl.program_id(3)
    nk = pl.num_programs(3)
    tq = q_ref.shape[2]
    tkv = k_ref.shape[2]

    @pl.when(ki == 0)
    def _():
        m_ref[...] = jnp.full(m_ref.shape, -1e30, jnp.float32)
        l_ref[...] = jnp.zeros(l_ref.shape, jnp.float32)
        acc_ref[...] = jnp.zeros(acc_ref.shape, jnp.float32)

    def process(masked):
        q = q_ref[0, 0]                                   # 1/sqrt(D) already folded into q
        k = k_ref[0, 0]
        s = jax.lax.dot_general(q, k, (((1,), (1,)), ((), ())),
                                preferred_element_type=jnp.float32)   # [tq, tkv]
        if masked:                  # only diagonal-straddling tiles pay iota/compare/select
            row = qi * tq + jax.lax.broadcasted_iota(jnp.int32, (tq, tkv), 0)
            col = ki * tkv + jax.lax.broadcasted_iota(jnp.int32, (tq, tkv), 1)
            s = jnp.where(row >= col, s, -1e30)           # causal (seq_start = 0)
        m_new = jnp.maximum(m_ref[...], jnp.max(s, axis=-1, keepdims=True))
        alpha = jnp.exp(m_ref[...] - m_new)
        p = jnp.exp(s - m_new)
        l_ref[...] = alpha * l_ref[...] + jnp.sum(p, axis=-1, keepdims=True)
        acc_ref[...] = alpha * acc_ref[...] + jnp.dot(
            p.astype(v_ref.dtype), v_ref[0, 0], preferred_element_type=jnp.float32)
        m_ref[...] = m_new

    needed = ki * tkv < (qi + 1) * tq                 # KV tile has >= 1 visible column
    full_vis = (ki + 1) * tkv <= qi * tq + 1          # KV tile entirely below diagonal

    @pl.when(needed & full_vis)
    def _():
        process(False)

    @pl.when(needed & jnp.logical_not(full_vis))
    def _():
        process(True)

    @pl.when(ki == nk - 1)
    def _():
        o_ref[0] = (acc_ref[...] / l_ref[...]).astype(o_ref.dtype)


def _attention(q, k, v):
    B, H, S, D = q.shape
    tq = _pick(S, (256, 128))
    tkv = _pick(S, (512, 256, 128))
    nq, nk = S // tq, S // tkv

    def kv_map(b, h, qi, ki):
        # clamp causally-dead KV tiles to the last needed block -> their DMA is skipped
        last = ((qi + 1) * tq - 1) // tkv
        return (b, h, jnp.minimum(ki, last), 0)

    return pl.pallas_call(
        flash_attn_kernel,
        out_shape=jax.ShapeDtypeStruct((B, S, H * D), q.dtype),
        grid=(B, H, nq, nk),
        in_specs=[
            pl.BlockSpec((1, 1, tq, D), lambda b, h, qi, ki: (b, h, qi, 0)),
            pl.BlockSpec((1, 1, tkv, D), kv_map),
            pl.BlockSpec((1, 1, tkv, D), kv_map),
        ],
        # attention output written directly in [B, S, Dm] layout (head h -> Dm block h)
        out_specs=pl.BlockSpec((1, tq, D), lambda b, h, qi, ki: (b, qi, h)),
        scratch_shapes=[pltpu.VMEM((tq, 1), jnp.float32),
                        pltpu.VMEM((tq, 1), jnp.float32),
                        pltpu.VMEM((tq, D), jnp.float32)],
        compiler_params=_cparams(("parallel", "parallel", "parallel", "arbitrary")),
    )(q, k, v)


# ------------------- kernel 3: output projection (deep-K matmul + residual) ------

def out_proj_kernel(a_ref, w_ref, r_ref, o_ref, acc_ref):
    kk = pl.program_id(2)

    @pl.when(kk == 0)
    def _():
        acc_ref[...] = r_ref[...].astype(jnp.float32)      # residual folded into init

    acc_ref[...] += jnp.dot(a_ref[...], w_ref[...],
                            preferred_element_type=jnp.float32)

    @pl.when(kk == pl.num_programs(2) - 1)
    def _():
        o_ref[...] = acc_ref[...].astype(o_ref.dtype)


def _out_proj(attn_flat, wo, resid_flat):
    T, Dm = attn_flat.shape
    tm = _pick(T, (512, 256, 128))
    tn = _pick(Dm, (512, 256, 128))
    tk = _pick(Dm, (1024, 512, 256, 128))
    return pl.pallas_call(
        out_proj_kernel,
        out_shape=jax.ShapeDtypeStruct((T, Dm), attn_flat.dtype),
        grid=(T // tm, Dm // tn, Dm // tk),
        in_specs=[
            pl.BlockSpec((tm, tk), lambda m, n, kk: (m, kk)),
            pl.BlockSpec((tk, tn), lambda m, n, kk: (kk, n)),
            pl.BlockSpec((tm, tn), lambda m, n, kk: (m, n)),
        ],
        out_specs=pl.BlockSpec((tm, tn), lambda m, n, kk: (m, n)),
        scratch_shapes=[pltpu.VMEM((tm, tn), jnp.float32)],
        compiler_params=_cparams(("parallel", "parallel", "arbitrary")),
    )(attn_flat, wo, resid_flat)


# ------------------- kernel 4: RMSNorm + router gate (lane-padded) ----------------

def gate_kernel(x_ref, g_ref, w_ref, o_ref):
    x = x_ref[...].astype(jnp.float32)
    var = jnp.mean(x * x, axis=-1, keepdims=True)
    xn = (x * jax.lax.rsqrt(var + RMS_EPS) *
          g_ref[...].astype(jnp.float32)).astype(x_ref.dtype)
    o_ref[...] = jnp.dot(xn, w_ref[...], preferred_element_type=jnp.float32)


def _gate(x_flat, g, wg_pad):
    T, Dm = x_flat.shape
    Ep = wg_pad.shape[-1]                       # padded to >= 128 for lane-dense stores
    tm = _pick(T, (512, 256, 128))
    return pl.pallas_call(
        gate_kernel,
        out_shape=jax.ShapeDtypeStruct((T, Ep), jnp.float32),
        grid=(T // tm,),
        in_specs=[pl.BlockSpec((tm, Dm), lambda t: (t, 0)),
                  pl.BlockSpec((1, Dm), lambda t: (0, 0)),
                  pl.BlockSpec((Dm, Ep), lambda t: (0, 0))],
        out_specs=pl.BlockSpec((tm, Ep), lambda t: (t, 0)),
        compiler_params=_cparams(("parallel",)),
    )(x_flat, g, wg_pad)


# ------------------- kernel 5: MoE (fused post-attn RMSNorm + residual) -----------

def moe_kernel(flags_ref, x_ref, g_ref, w13_ref, w2_ref, rw_ref,
               o_ref, xn_ref, acc_ref):
    t = pl.program_id(0)
    e = pl.program_id(1)
    f = pl.program_id(2)
    nE = pl.num_programs(1)
    nF = pl.num_programs(2)
    tf = w13_ref.shape[-1] // 2

    @pl.when((e == 0) & (f == 0))
    def _():
        x = x_ref[...].astype(jnp.float32)                 # h1 tile (= residual)
        acc_ref[...] = x                                   # residual folded into init
        var = jnp.mean(x * x, axis=-1, keepdims=True)
        xn = x * jax.lax.rsqrt(var + RMS_EPS) * g_ref[...].astype(jnp.float32)
        xn_ref[...] = xn.astype(xn_ref.dtype)              # cached normalized tile

    @pl.when(flags_ref[t * nE + e] > 0)                    # skip experts w/o routed tokens
    def _():
        xn = xn_ref[...]
        # fused w1|w3: one N = 2*tf matmul, split halves
        gu = jnp.dot(xn, w13_ref[0, 0], preferred_element_type=jnp.float32)   # [tt, 2*tf]
        gate = gu[:, :tf]
        up = gu[:, tf:]
        hmid = (gate * jax.nn.sigmoid(gate) * up).astype(xn.dtype)            # silu(gate)*up
        down = jnp.dot(hmid, w2_ref[0], preferred_element_type=jnp.float32)   # [tt, Dm]
        acc_ref[...] += rw_ref[0].astype(jnp.float32) * down                  # [tt,1] route w

    @pl.when((e == nE - 1) & (f == nF - 1))
    def _():
        o_ref[...] = acc_ref[...].astype(o_ref.dtype)


def _prep_w13(w1, w3, tf):
    """One-time weight prep: fuse w1|w3 into per-F-tile slabs [E, F//tf, Dm, 2*tf]."""
    E, Dm, F = w1.shape
    nf = F // tf
    w13 = jnp.concatenate([w1.reshape(E, Dm, nf, tf),
                           w3.reshape(E, Dm, nf, tf)], axis=-1)   # [E, Dm, nf, 2*tf]
    return w13.transpose(0, 2, 1, 3)                               # [E, nf, Dm, 2*tf]


def _moe(flags, x_flat, g2, w13r, w2, route, *, tt, tf):
    T, Dm = x_flat.shape
    E, F, _ = w2.shape
    nf = F // tf

    def w13_map(t, e, f, flg):
        # inactive (token-tile, expert): clamp f to 0 so repeated steps skip the weight DMA
        return (e, jnp.where(flg[t * E + e] > 0, f, 0), 0, 0)

    def w2_map(t, e, f, flg):
        return (e, jnp.where(flg[t * E + e] > 0, f, 0), 0)

    grid_spec = pltpu.PrefetchScalarGridSpec(
        num_scalar_prefetch=1,
        grid=(T // tt, E, nf),
        in_specs=[
            pl.BlockSpec((tt, Dm), lambda t, e, f, flg: (t, 0)),        # h1 (residual + norm in)
            pl.BlockSpec((1, Dm), lambda t, e, f, flg: (0, 0)),         # ln2 gamma
            pl.BlockSpec((1, 1, Dm, 2 * tf), w13_map),                  # fused w1|w3 slab
            pl.BlockSpec((1, tf, Dm), w2_map),                          # w2
            pl.BlockSpec((1, tt, 1), lambda t, e, f, flg: (e, t, 0)),   # dense routing weights
        ],
        out_specs=pl.BlockSpec((tt, Dm), lambda t, e, f, flg: (t, 0)),
        scratch_shapes=[pltpu.VMEM((tt, Dm), x_flat.dtype),
                        pltpu.VMEM((tt, Dm), jnp.float32)],
    )
    return pl.pallas_call(
        moe_kernel,
        grid_spec=grid_spec,
        out_shape=jax.ShapeDtypeStruct((T, Dm), x_flat.dtype),
        compiler_params=_cparams(("parallel", "arbitrary", "arbitrary")),
    )(flags, x_flat, g2, w13r, w2, route)


# ------------------------------- layer forward ------------------------------------

def cached_mixtral_layer(stm, p):
    """Forward of CachedMixtralLayer (seq_start=0 prefill, cache_tag=None)."""
    B, S, H, D = stm.shape
    Dm = H * D
    T = B * S
    x_bsd = stm.reshape(B, S, Dm)

    # RoPE tables (sin first half pre-negated so rotate_half == lane-rotation * sin)
    half = D // 2
    pos = jnp.arange(S, dtype=jnp.float32)
    inv_freq = 1.0 / (ROPE_THETA ** (jnp.arange(half, dtype=jnp.float32) / half))
    ang = pos[:, None] * inv_freq[None, :]
    cos = jnp.concatenate([jnp.cos(ang), jnp.cos(ang)], axis=-1)
    sin = jnp.concatenate([-jnp.sin(ang), jnp.sin(ang)], axis=-1)

    # --- input_layernorm + fused QKV projection + RoPE ---
    q, k, v = _qkv_rope(x_bsd, p["ln1_w"], p["wqkv"], cos, sin)     # each [B, H, S, D]

    # --- causal self-attention (prefill); output already in [B, S, Dm] layout ---
    attn = _attention(q, k, v)
    attn_flat = attn.reshape(T, Dm)
    x_flat = x_bsd.reshape(T, Dm)

    # --- output projection (deep-K tiled matmul) + residual ---
    h1_flat = _out_proj(attn_flat, p["wo"], x_flat)                 # [T, Dm]

    # --- post_attention_layernorm + router gate (fused), top-2 routing ---
    E = p["w1"].shape[0]
    Ep = max(128, ((E + 127) // 128) * 128)
    wg_pad = jnp.pad(p["wg"], ((0, 0), (0, Ep - E)))                # lane-dense gate output
    logits = _gate(h1_flat, p["ln2_w"], wg_pad)[:, :E]              # [T, E] f32

    topv, topi = jax.lax.top_k(logits, 2)
    gate_w = jax.nn.softmax(topv, axis=-1)
    gate_w = gate_w.astype(stm.dtype).astype(jnp.float32)           # torch casts routing w to bf16
    dense = jnp.zeros((T, E), jnp.float32).at[jnp.arange(T)[:, None], topi].add(gate_w)
    route = dense.T.reshape(E, T, 1)                                # [E, T, 1]

    F = p["w1"].shape[-1]
    tt = _pick(T, _SEQ_TILES)
    tf = _pick(F, _MOE_F_TILES)
    flags = (dense.reshape(T // tt, tt, E) > 0).any(axis=1)
    flags = flags.astype(jnp.int32).reshape(-1)                     # 1-D SMEM flags, [(T//tt)*E]
    w13r = _prep_w13(p["w1"], p["w3"], tf)                          # one-time weight prep

    # --- MoE (post-attn norm fused in kernel) + residual ---
    out = _moe(flags, h1_flat, p["ln2_w"], w13r, p["w2"], route, tt=tt, tf=tf)
    return out.reshape(B, S, H, D)


# ------------------------------- params ---------------------------------------------

def init_params(key, H, D, F, E, dtype=BF16):
    Dm = H * D
    ks = jax.random.split(key, 8)
    n = lambda k, shape: (0.02 * jax.random.normal(k, shape, jnp.float32)).astype(dtype)

    # torch Linear weight is [out, in]; stored here transposed ([in, out]) and reshaped once
    # into per-head / per-expert slabs for the kernels (one-time weight prep).
    def per_head(k):
        return n(k, (Dm, Dm)).reshape(Dm, H, D).transpose(1, 0, 2)          # [H, Dm, D]

    wqkv = jnp.concatenate([per_head(ks[0]), per_head(ks[1]), per_head(ks[2])],
                           axis=-1)                                          # [H, Dm, 3D]
    return {
        "ln1_w": jnp.ones((1, Dm), dtype),
        "ln2_w": jnp.ones((1, Dm), dtype),
        "wqkv": wqkv,
        "wo": n(ks[3], (Dm, Dm)),           # [Dm(in, head-major), Dm(out)]
        "wg": n(ks[4], (Dm, E)),
        "w1": n(ks[5], (E, Dm, F)),
        "w3": n(ks[6], (E, Dm, F)),
        "w2": n(ks[7], (E, F, Dm)),
    }


if __name__ == "__main__":
    B, S, H, D = 2, 8, 2, 128      # batch, seq, num_head, head_dim (head_dim=128 as in Mixtral)
    Dm = H * D                     # inner_dim = 256
    F = 256                        # mlp_inner_dim
    E = 4                          # num_expert_mlp

    key = jax.random.PRNGKey(0)
    k_params, k_x = jax.random.split(key)
    params = init_params(k_params, H, D, F, E)
    stm = jax.random.normal(k_x, (B, S, H, D), jnp.float32).astype(BF16)

    out = cached_mixtral_layer(stm, params)
    out = jax.block_until_ready(out)
    assert out.shape == (B, S, H, D) and out.dtype == BF16
    assert bool(jnp.all(jnp.isfinite(out.astype(jnp.float32))))
    print("KERNEL_OK")
</pallas_src>

<mosaic_0001>
module attributes {stable_mosaic.version = 11 : i64} {
  func.func @qkv_rope_kernel(%arg0: i32, %arg1: i32, %arg2: i32, %arg3: memref<1x8x256xbf16, #tpu.memory_space<vmem>>, %arg4: memref<1x256xbf16, #tpu.memory_space<vmem>>, %arg5: memref<1x256x384xbf16, #tpu.memory_space<vmem>>, %arg6: memref<8x128xf32, #tpu.memory_space<vmem>>, %arg7: memref<8x128xf32, #tpu.memory_space<vmem>>, %arg8: memref<1x1x8x128xbf16, #tpu.memory_space<vmem>>, %arg9: memref<1x1x8x128xbf16, #tpu.memory_space<vmem>>, %arg10: memref<1x1x8x128xbf16, #tpu.memory_space<vmem>>, %arg11: memref<8x256xbf16, #tpu.memory_space<vmem>>) attributes {dimension_semantics = [#tpu.dimension_semantics<parallel>, #tpu.dimension_semantics<parallel>, #tpu.dimension_semantics<arbitrary>], iteration_bounds = array<i64: 2, 1, 2>, scalar_prefetch = 0 : i64, scratch_operands = 1 : i64, tpu.core_type = #tpu.core_type<tc>, window_params = [{transform_indices = @transform_0, window_bounds = array<i64: 1, 8, 256>}, {pipeline_mode = #tpu.pipeline_mode<synchronous>, transform_indices = @transform_1, window_bounds = array<i64: 1, 256>}, {transform_indices = @transform_2, window_bounds = array<i64: 1, 256, 384>}, {transform_indices = @transform_3, window_bounds = array<i64: 8, 128>}, {transform_indices = @transform_4, window_bounds = array<i64: 8, 128>}, {transform_indices = @transform_5, window_bounds = array<i64: 1, 1, 8, 128>}, {transform_indices = @transform_6, window_bounds = array<i64: 1, 1, 8, 128>}, {transform_indices = @transform_7, window_bounds = array<i64: 1, 1, 8, 128>}]} {
    %c0_i32 = arith.constant 0 : i32
    %0 = arith.cmpi eq, %arg2, %c0_i32 : i32
    %1 = arith.extui %0 : i1 to i32
    %c0_i32_0 = arith.constant 0 : i32
    %2 = arith.cmpi ne, %1, %c0_i32_0 : i32
    scf.if %2 {
      %c0_22 = arith.constant 0 : index
      %c0_23 = arith.constant 0 : index
      %c0_24 = arith.constant 0 : index
      %38 = vector.load %arg3[%c0_22, %c0_23, %c0_24] : memref<1x8x256xbf16, #tpu.memory_space<vmem>>, vector<1x8x256xbf16>
      %39 = vector.shape_cast %38 : vector<1x8x256xbf16> to vector<8x256xbf16>
      %40 = arith.extf %39 : vector<8x256xbf16> to vector<8x256xf32>
      %41 = arith.mulf %40, %40 : vector<8x256xf32>
      %cst_25 = arith.constant dense<0.000000e+00> : vector<8xf32>
      %42 = vector.multi_reduction <add>, %41, %cst_25 [1] : vector<8x256xf32> to vector<8xf32>
      %43 = vector.shape_cast %42 : vector<8xf32> to vector<8x1xf32>
      %cst_26 = arith.constant 2.560000e+02 : f32
      %44 = vector.broadcast %cst_26 : f32 to vector<8x1xf32>
      %45 = arith.divf %43, %44 : vector<8x1xf32>
      %cst_27 = arith.constant 9.99999974E-6 : f32
      %46 = vector.broadcast %cst_27 : f32 to vector<8x1xf32>
      %47 = arith.addf %45, %46 : vector<8x1xf32>
      %48 = math.rsqrt %47 : vector<8x1xf32>
      %49 = vector.broadcast %48 : vector<8x1xf32> to vector<8x256xf32>
      %50 = arith.mulf %40, %49 : vector<8x256xf32>
      %c0_28 = arith.constant 0 : index
      %c0_29 = arith.constant 0 : index
      %51 = vector.load %arg4[%c0_28, %c0_29] : memref<1x256xbf16, #tpu.memory_space<vmem>>, vector<1x256xbf16>
      %52 = arith.extf %51 : vector<1x256xbf16> to vector<1x256xf32>
      %53 = vector.broadcast %52 : vector<1x256xf32> to vector<8x256xf32>
      %54 = arith.mulf %50, %53 : vector<8x256xf32>
      %55 = arith.truncf %54 : vector<8x256xf32> to vector<8x256xbf16>
      %c0_30 = arith.constant 0 : index
      %c0_31 = arith.constant 0 : index
      %56 = vector.load %arg11[%c0_30, %c0_31] : memref<8x256xbf16, #tpu.memory_space<vmem>>, vector<8x256xbf16>
      tpu.vector_store %arg11[%c0_30, %c0_31], %55 {strides = array<i32>} : memref<8x256xbf16, #tpu.memory_space<vmem>>, vector<8x256xbf16>,
    } else {
    }
    %c0 = arith.constant 0 : index
    %c0_1 = arith.constant 0 : index
    %3 = vector.load %arg11[%c0, %c0_1] : memref<8x256xbf16, #tpu.memory_space<vmem>>, vector<8x256xbf16>
    %c0_2 = arith.constant 0 : index
    %c0_3 = arith.constant 0 : index
    %c0_4 = arith.constant 0 : index
    %4 = vector.load %arg5[%c0_2, %c0_3, %c0_4] : memref<1x256x384xbf16, #tpu.memory_space<vmem>>, vector<1x256x384xbf16>
    %5 = vector.shape_cast %4 : vector<1x256x384xbf16> to vector<256x384xbf16>
    %cst = arith.constant dense<0.000000e+00> : vector<8x384xf32>
    %6 = tpu.matmul %3, %5, %cst {dimension_numbers = #tpu.dot_dimension_numbers<[1], [0], [0], [1], [0, 0, 1, 1], [], []>} : vector<8x256xbf16>, vector<256x384xbf16>, vector<8x384xf32> -> vector<8x384xf32>
    %7 = vector.extract_strided_slice %6 {offsets = [0, 0], sizes = [8, 128], strides = [1, 1]} : vector<8x384xf32> to vector<8x128xf32>
    %8 = vector.extract_strided_slice %6 {offsets = [0, 128], sizes = [8, 128], strides = [1, 1]} : vector<8x384xf32> to vector<8x128xf32>
    %9 = vector.extract_strided_slice %6 {offsets = [0, 256], sizes = [8, 128], strides = [1, 1]} : vector<8x384xf32> to vector<8x128xf32>
    %c0_5 = arith.constant 0 : index
    %c0_6 = arith.constant 0 : index
    %10 = vector.load %arg6[%c0_5, %c0_6] : memref<8x128xf32, #tpu.memory_space<vmem>>, vector<8x128xf32>
    %c0_7 = arith.constant 0 : index
    %c0_8 = arith.constant 0 : index
    %11 = vector.load %arg7[%c0_7, %c0_8] : memref<8x128xf32, #tpu.memory_space<vmem>>, vector<8x128xf32>
    %12 = vector.extract_strided_slice %7 {offsets = [0, 64], sizes = [8, 64], strides = [1, 1]} : vector<8x128xf32> to vector<8x64xf32>
    %13 = vector.extract_strided_slice %7 {offsets = [0, 0], sizes = [8, 64], strides = [1, 1]} : vector<8x128xf32> to vector<8x64xf32>
    %14 = tpu.concatenate %12, %13 in 1 : vector<8x64xf32>, vector<8x64xf32> -> vector<8x128xf32>
    %15 = arith.mulf %7, %10 : vector<8x128xf32>
    %16 = arith.mulf %14, %11 : vector<8x128xf32>
    %17 = arith.addf %15, %16 : vector<8x128xf32>
    %cst_9 = arith.constant 0.0883883461 : f32
    %18 = vector.broadcast %cst_9 : f32 to vector<8x128xf32>
    %19 = arith.mulf %17, %18 : vector<8x128xf32>
    %20 = arith.truncf %19 : vector<8x128xf32> to vector<8x128xbf16>
    %c0_10 = arith.constant 0 : index
    %c0_11 = arith.constant 0 : index
    %c0_12 = arith.constant 0 : index
    %c0_13 = arith.constant 0 : index
    %21 = vector.load %arg8[%c0_10, %c0_11, %c0_12, %c0_13] : memref<1x1x8x128xbf16, #tpu.memory_space<vmem>>, vector<1x1x8x128xbf16>
    %22 = vector.shape_cast %21 : vector<1x1x8x128xbf16> to vector<8x128xbf16>
    %23 = vector.shape_cast %20 : vector<8x128xbf16> to vector<1x1x8x128xbf16>
    tpu.vector_store %arg8[%c0_10, %c0_11, %c0_12, %c0_13], %23 {strides = array<i32>} : memref<1x1x8x128xbf16, #tpu.memory_space<vmem>>, vector<1x1x8x128xbf16>,
    %24 = vector.extract_strided_slice %8 {offsets = [0, 64], sizes = [8, 64], strides = [1, 1]} : vector<8x128xf32> to vector<8x64xf32>
    %25 = vector.extract_strided_slice %8 {offsets = [0, 0], sizes = [8, 64], strides = [1, 1]} : vector<8x128xf32> to vector<8x64xf32>
    %26 = tpu.concatenate %24, %25 in 1 : vector<8x64xf32>, vector<8x64xf32> -> vector<8x128xf32>
    %27 = arith.mulf %8, %10 : vector<8x128xf32>
    %28 = arith.mulf %26, %11 : vector<8x128xf32>
    %29 = arith.addf %27, %28 : vector<8x128xf32>
    %30 = arith.truncf %29 : vector<8x128xf32> to vector<8x128xbf16>
    %c0_14 = arith.constant 0 : index
    %c0_15 = arith.constant 0 : index
    %c0_16 = arith.constant 0 : index
    %c0_17 = arith.constant 0 : index
    %31 = vector.load %arg9[%c0_14, %c0_15, %c0_16, %c0_17] : memref<1x1x8x128xbf16, #tpu.memory_space<vmem>>, vector<1x1x8x128xbf16>
    %32 = vector.shape_cast %31 : vector<1x1x8x128xbf16> to vector<8x128xbf16>
    %33 = vector.shape_cast %30 : vector<8x128xbf16> to vector<1x1x8x128xbf16>
    tpu.vector_store %arg9[%c0_14, %c0_15, %c0_16, %c0_17], %33 {strides = array<i32>} : memref<1x1x8x128xbf16, #tpu.memory_space<vmem>>, vector<1x1x8x128xbf16>,
    %34 = arith.truncf %9 : vector<8x128xf32> to vector<8x128xbf16>
    %c0_18 = arith.constant 0 : index
    %c0_19 = arith.constant 0 : index
    %c0_20 = arith.constant 0 : index
    %c0_21 = arith.constant 0 : index
    %35 = vector.load %arg10[%c0_18, %c0_19, %c0_20, %c0_21] : memref<1x1x8x128xbf16, #tpu.memory_space<vmem>>, vector<1x1x8x128xbf16>
    %36 = vector.shape_cast %35 : vector<1x1x8x128xbf16> to vector<8x128xbf16>
    %37 = vector.shape_cast %34 : vector<8x128xbf16> to vector<1x1x8x128xbf16>
    tpu.vector_store %arg10[%c0_18, %c0_19, %c0_20, %c0_21], %37 {strides = array<i32>} : memref<1x1x8x128xbf16, #tpu.memory_space<vmem>>, vector<1x1x8x128xbf16>,
    return
  }
  func.func @transform_0(%arg0: i32, %arg1: i32, %arg2: i32) -> (i32, i32, i32) {
    %c0_i32 = arith.constant 0 : i32
    %c0_i32_0 = arith.constant 0 : i32
    return %arg0, %arg1, %c0_i32 : i32, i32, i32
  }
  func.func @transform_1(%arg0: i32, %arg1: i32, %arg2: i32) -> (i32, i32) {
    %c0_i32 = arith.constant 0 : i32
    %c0_i32_0 = arith.constant 0 : i32
    %c0_i32_1 = arith.constant 0 : i32
    return %c0_i32, %c0_i32_0 : i32, i32
  }
  func.func @transform_2(%arg0: i32, %arg1: i32, %arg2: i32) -> (i32, i32, i32) {
    %c0_i32 = arith.constant 0 : i32
    %c0_i32_0 = arith.constant 0 : i32
    %c0_i32_1 = arith.constant 0 : i32
    return %arg2, %c0_i32, %c0_i32_0 : i32, i32, i32
  }
  func.func @transform_3(%arg0: i32, %arg1: i32, %arg2: i32) -> (i32, i32) {
    %c0_i32 = arith.constant 0 : i32
    %c0_i32_0 = arith.constant 0 : i32
    return %arg1, %c0_i32 : i32, i32
  }
  func.func @transform_4(%arg0: i32, %arg1: i32, %arg2: i32) -> (i32, i32) {
    %c0_i32 = arith.constant 0 : i32
    %c0_i32_0 = arith.constant 0 : i32
    return %arg1, %c0_i32 : i32, i32
  }
  func.func @transform_5(%arg0: i32, %arg1: i32, %arg2: i32) -> (i32, i32, i32, i32) {
    %c0_i32 = arith.constant 0 : i32
    %c0_i32_0 = arith.constant 0 : i32
    return %arg0, %arg2, %arg1, %c0_i32 : i32, i32, i32, i32
  }
  func.func @transform_6(%arg0: i32, %arg1: i32, %arg2: i32) -> (i32, i32, i32, i32) {
    %c0_i32 = arith.constant 0 : i32
    %c0_i32_0 = arith.constant 0 : i32
    return %arg0, %arg2, %arg1, %c0_i32 : i32, i32, i32, i32
  }
  func.func @transform_7(%arg0: i32, %arg1: i32, %arg2: i32) -> (i32, i32, i32, i32) {
    %c0_i32 = arith.constant 0 : i32
    %c0_i32_0 = arith.constant 0 : i32
    return %arg0, %arg2, %arg1, %c0_i32 : i32, i32, i32, i32
  }
}

</mosaic_0001>

<bundles_post_ra>
// kernel: tpu_custom_call.1
= control target key start
LH: loop header
LB: loop body
LE: loop exit
PB: predicated region body
PF: predicated region fallthrough
CT: control target
= control target key end

     0   :  { %s2552_s0 = inlined_call_operand.hbm [shape: bf16[2,8,256], index: 0, kind: input, shape index: {}]   ;;  %s2553_s1 = inlined_call_operand.hbm [shape: bf16[1,256], index: 1, kind: input, shape index: {}]   ;;  %s2554_s2 = inlined_call_operand.hbm [shape: bf16[2,256,384], index: 2, kind: input, shape index: {}]   ;;  %s2555_s3 = inlined_call_operand.hbm [shape: f32[8,128], index: 3, kind: input, shape index: {}]   ;;  %s2556_s4 = inlined_call_operand.hbm [shape: f32[8,128], index: 4, kind: input, shape index: {}]   ;;  %s2557_s5 = inlined_call_operand.hbm [shape: bf16[2,2,8,128], index: 5, kind: output, shape index: {0}]   ;;  %s2558_s6 = inlined_call_operand.hbm [shape: bf16[2,2,8,128], index: 6, kind: output, shape index: {1}]   ;;  %s2559_s7 = inlined_call_operand.hbm [shape: bf16[2,2,8,128], index: 7, kind: output, shape index: {2}]  }
   0x1   :  { %2581 = sst [smem:[#allocation36_spill]] %s2552_s0 }
   0x2   :  { %2582 = sst [smem:[#allocation37_spill]] %s2553_s1 }
   0x3   :  { %2583 = sst [smem:[#allocation38_spill]] %s2554_s2 }
   0x4   :  { %2584 = sst [smem:[#allocation39_spill]] %s2555_s3 }
   0x5   :  { %2585 = sst [smem:[#allocation40_spill]] %s2556_s4 }
   0x6   :  { %2586 = sst [smem:[#allocation41_spill]] %s2557_s5 }
   0x7   :  { %2587 = sst [smem:[#allocation42_spill]] %s2558_s6 }
   0x8   :  { %2588 = sst [smem:[#allocation43_spill]] %s2559_s7 }
   0x9   :  { %13 = vsyncpa [#allocation4], 0 }
   0xa   :  { %15 = vsyncpa [#allocation4 + $0x1], 0 }
   0xb   :  { %16 = vsyncpa [#allocation7], 0 }
   0xc   :  { %17 = vsyncpa [#allocation11], 0 }
   0xd   :  { %18 = vsyncpa [#allocation5], 0 }
   0xe   :  { %20 = vsyncpa [#allocation5 + $0x1], 0 }
   0xf   :  { %21 = vsyncpa [#allocation14], 0 }
  0x10   :  { %23 = vsyncpa [#allocation14 + $0x1], 0  ;;  %s2073_s24 = smov 0   ;;  %s2075_s25 = smov 0  }
  0x11   :  { %s2077_s26 = smov 0   ;;  %s2079_s27 = smov 0  }
  0x12   :  { %s2081_s28 = smov 0   ;;  %s2083_s29 = smov 0  }
  0x13   :  { %s2085_s30 = smov 0   ;;  %s2087_s8 = smov 0  }
  0x14   :  { %s2089_s9 = smov 0   ;;  %s2091_s10 = smov 0  }
  0x15   :  { %s2093_s11 = smov 0   ;;  %s2095_s12 = smov 0  }
  0x16   :  { %s2097_s13 = smov 0   ;;  %s2099_s14 = smov 0  }
  0x17 LB: > { %2589 = sst [smem:[#allocation23_spill]] %s1972_s24  ;;  %s2142_s15 = sadd.s32 4294967295, %s2024_s14   ;;  %s2024_s14 = sphi %s2099_s14, %s29_s14   ;;  %s2020_s13 = sphi %s2097_s13, %s2655_s13   ;;  %s2016_s12 = sphi %s2095_s12, %s2654_s12   ;;  %s2012_s11 = sphi %s2093_s11, %s2653_s11   ;;  %s2008_s10 = sphi %s2091_s10, %s2652_s10   ;;  %s2004_s9 = sphi %s2089_s9, %s2651_s9   ;;  %s2000_s8 = sphi %s2087_s8, %s2650_s8   ;;  %s1996_s30 = sphi %s2085_s30, %s2649_s30   ;;  %s1992_s29 = sphi %s2083_s29, %s2648_s29   ;;  %s1988_s28 = sphi %s2081_s28, %s2647_s28   ;;  %s1984_s27 = sphi %s2079_s27, %s2639_s27   ;;  %s1980_s26 = sphi %s2077_s26, %s2646_s26   ;;  %s1976_s25 = sphi %s2075_s25, %s2645_s25   ;;  %s1972_s24 = sphi %s2073_s24, %s2638_s24  }
  0x18   : > { %2590 = sst [smem:[#allocation24_spill]] %s1976_s25  ;;  %s2560_s16 = sadd.s32 4294967294, %s2024_s14  }
  0x19   : > { %2591 = sst [smem:[#allocation25_spill]] %s1988_s28  ;;  %p71_p0 = scmp.eq.s32.totalorder %s2142_s15, 0 }
  0x1a   : > { %2592 = sst [smem:[#allocation26_spill]] %s2000_s8  ;;  %p117_p1 = scmp.ne.s32.totalorder %s1988_s28, %s1984_s27 }
  0x1b   : > { %2593 = sst [smem:[#allocation27_spill]] %s2008_s10  ;;  %p196_p2 = scmp.ne.s32.totalorder %s1980_s26, %s1976_s25 }
  0x1c   : > { %2594 = sst [smem:[#allocation28_spill]] %s2012_s11  ;;  %p197_p3 = scmp.eq.s32.totalorder %s2142_s15, 3 }
  0x1d   : > { %p2152_p4 = por %p117_p1, %p71_p0  ;;  %p202_p5 = scmp.ne.s32.totalorder %s1976_s25, %s1972_s24 }
  0x1e   : > { %p2158_p6 = por %p197_p3, %p196_p2  ;;  %p203_p7 = scmp.eq.s32.totalorder %s2560_s16, 3 }
  0x1f   : > { %s2595_s17 = scalar_select %p2152_p4, 1, 0 }
  0x20   : > { %s2597_s18 = scalar_select %p2158_p6, 1, 0 }
  0x21   : > { %2596 = sst [smem:[#allocation29_spill]] %s2595_s17  ;;  %p1199_p8 = scmp.ge.s32.totalorder %s2024_s14, 1 }
  0x22   : > { %2598 = sst [smem:[#allocation30_spill]] %s2597_s18  ;;  %p270_p9 = scmp.lt.s32.totalorder %s2024_s14, 5 }
  0x23   : > { %p2166_p10 = por %p203_p7, %p202_p5  ;;  %s2602_s1 = sld [smem:[#allocation37_spill]] }
  0x24   : > { %p2170_p11 = pnand %p1199_p8, %p270_p9  ;;  %s2026_s27 = smov [#allocation6]  }
  0x25   : > { %s2599_s19 = scalar_select %p2166_p10, 1, 0 }
  0x26   : > { %p1494_p12 = pneg %p2170_p11  ;;  %s284_s16 = sshll.u32 %s2026_s27, 4  ;;  %s285_s16 = int_to_ptr.vmem [resolvable:$true] %s284_s16 }
  0x27   : > { %2600 = sst [smem:[#allocation31_spill]] %s2599_s19  ;;  %s41_s21 = sadd.s32 1, %s2016_s12 }
  0x28   : > { %p2181_p13 = pnand %p1494_p12, %p71_p0  ;;  %s48_s22 = sadd.s32 1, %s2020_s13 }
  0x29   : > { %s282_s23 = sshll.u32 %s2602_s1, 4  ;;  %p42_p1 = scmp.ge.s32.totalorder %s41_s21, 2  ;;  %s283_s23 = int_to_ptr.hbm [resolvable:$true] %s282_s23 }
  0x2a   : > { %1497 = dma.hbm_to_vmem [thread:$0]  (!%p2181_p13), %s283_s23, 32, %s285_s16, [#allocation7]  }
  0x2b   : > { %s57_s1 = sadd.s32 1, %s2004_s9  ;;  %p64_p2 = scmp.ne.s32.totalorder %s2004_s9, %s2000_s8 }
  0x2c   : > { %p65_p3 = scmp.eq.s32.totalorder %s2024_s14, 0  ;;  %s2657_s21 = smov (%p42_p1, %s41_s21), 0 }
  0x2d   : > { %2604 = sst [smem:[#allocation32_spill]] %s2657_s21  ;;  %s2659_s22 = smov (!%p42_p1, %s48_s22), %s2020_s13 }
  0x2e   : > { %p2198_p5 = por %p65_p3, %p64_p2  ;;  %p70_p7 = scmp.ne.s32.totalorder %s2000_s8, %s1996_s30 }
  0x2f   : > { %p50_p8 = scmp.ge.s32.totalorder %s2659_s22, 2  ;;  %s101_s23 = ssub.s32 %s2016_s12, %s2657_s21 }
  0x30   : > { %p2208_p9 = por %p71_p0, %p70_p7  ;;  %p102_p12 = scmp.eq.s32.totalorder %s101_s23, 0 }
  0x31   : > { %s2661_s22 = smov (%p50_p8, %s2659_s22), 0  ;;  %s104_s24 = sadd.s32 1, %s1992_s29 }
  0x32   : > { %s2606_s27 = scalar_select %p2208_p9, 1, 0 }
  0x33   : > { %2608 = sst [smem:[#allocation34_spill]] %s2661_s22  ;;  %p111_p1 = scmp.ne.s32.totalorder %s1992_s29, %s1988_s28 }
  0x34   : > { %2607 = sst [smem:[#allocation33_spill]] %s2606_s27  ;;  %s52_s7 = ssub.s32 %s2020_s13, %s2661_s22 }
  0x35   : > { %s186_s18 = sadd.s32 1, %s1980_s26  ;;  %p55_p2 = scmp.eq.s32.totalorder %s52_s7, 0 }
  0x36   : > { %p2222_p10 = por %p111_p1, %p65_p3  ;;  %s181_s5 = sor.u32 %s101_s23, %s52_s7 }
  0x37   : > { %s2227_s21 = scalar_select %p102_p12, %s1992_s29, %s104_s24  }
  0x38   : > { %s2230_s6 = scalar_select %p55_p2, %s2004_s9, %s57_s1  }
  0x39   : > { %2610 = sst [smem:[#allocation35_spill]] %s2227_s21  ;;  %p1524_p7 = scmp.lt.s32.totalorder %s2024_s14, 4 }
  0x3a   : > { %p184_p8 = scmp.eq.s32.totalorder %s181_s5, 0  ;;  %s323_s11 = sand.u32 1, %s2024_s14  }
  0x3b   : > { %s325_s22 = sand.u32 1, %s2004_s9   ;;  %s1420_s17 = sshll.u32 %s2020_s13, 3 }
  0x3c   : > { %s2236_s10 = scalar_select %p184_p8, %s1980_s26, %s186_s18  }
  0x3d   : > { %s1204_s25 = sshll.u32 %s325_s22, 3  ;;  %s2611_s0 = sld [smem:[#allocation36_spill]] }
  0x3e   : > { %s327_s8 = scalar_lea.vmem [#allocation3], %s1204_s25  ;;  %p1505_p3 = pnand %p1524_p7, %p2198_p5 }
  0x3f   : > { %s338_s1 = sshll.u32 %s327_s8, 4  ;;  %p2250_p12 = pnand %p1524_p7, %p2222_p10  ;;  %s339_s1 = int_to_ptr.vmem [resolvable:$true] %s338_s1 }
  0x40   : > { %s2613_s3 = sld [smem:[#allocation39_spill]]  ;;  %s324_s25 = scalar_lea.sflag [#allocation4], %s323_s11 }
  0x41   : > { %s2027_s8 = smov [#allocation9]   ;;  %s2614_s4 = sld [smem:[#allocation40_spill]] }
  0x42   : > { %s2028_s27 = smov [#allocation10]   ;;  %s1470_s11 = smul.u32 384, %s2016_s12 }
  0x43   : > { %s334_s24 = scalar_lea.hbm %s2611_s0, %s1420_s17  ;;  %s298_s17 = sshll.u32 %s2027_s8, 4  ;;  %s299_s17 = int_to_ptr.vmem [resolvable:$true] %s298_s17 }
  0x44   : > { %s336_s21 = sshll.u32 %s334_s24, 4  ;;  %s312_s30 = sshll.u32 %s2028_s27, 4  ;;  %s337_s21 = int_to_ptr.hbm [resolvable:$true] %s336_s21  ;;  %s313_s30 = int_to_ptr.vmem [resolvable:$true] %s312_s30 }
  0x45   : > { %1507 = dma.hbm_to_vmem [thread:$0]  (!%p1505_p3), %s337_s21, 128, %s339_s1, %s324_s25  }
  0x46   : > { %s296_s28 = sshll.u32 %s2613_s3, 4  ;;  %s347_s24 = sand.u32 1, %s1992_s29   ;;  %s297_s28 = int_to_ptr.hbm [resolvable:$true] %s296_s28 }
  0x47   : > { %s310_s23 = sshll.u32 %s2614_s4, 4  ;;  %s1469_s7 = smul.u32 384, %s347_s24  ;;  %s311_s23 = int_to_ptr.hbm [resolvable:$true] %s310_s23 }
  0x48   : > { %1500 = dma.hbm_to_vmem [thread:$0]  (!%p2181_p13), %s297_s28, 128, %s299_s17, [#allocation7]  }
  0x49   : > { %1503 = dma.hbm_to_vmem [thread:$0]  (!%p2181_p13), %s311_s23, 128, %s313_s30, [#allocation11]  }
  0x4a   : > { %s349_s21 = scalar_lea.vmem [#allocation8], %s1469_s7  ;;  %s2615_s2 = sld [smem:[#allocation38_spill]] }
  0x4b   : > { %s357_s1 = sshll.u32 %s349_s21, 4  ;;  %s2029_s28 = smov 192   ;;  %s358_s1 = int_to_ptr.vmem [resolvable:$true] %s357_s1 }
  0x4c   : > { %s2030_s17 = smov 12   ;;  %s2616_s19 = sld [smem:[#allocation26_spill]] (!%p2170_p11) }
  0x4d   : > { %s2578_s23 = sand.u32 (!%p2170_p11), 1, %s2142_s15  }
  0x4e   : > { %369 = sbr.rel (%p2170_p11) target bundleno = 585 (0x249), region = 40  ;;  %s372_s24 = scalar_lea.sflag (!%p2170_p11), [#allocation4], %s2578_s23 }
  0x50   : > { %s354_s0 = scalar_lea.hbm %s2615_s2, %s1470_s11 }
  0x51   : > { %s355_s22 = sshll.u32 %s354_s0, 4  ;;  %s356_s22 = int_to_ptr.hbm [resolvable:$true] %s355_s22 }
  0x52   : > { %1510 = dma.hbm_to_vmem [thread:$0]  (!%p2250_p12), %s356_s22, 6144, %s358_s1, %s324_s25, %s2029_s28, %s2029_s28, %s2030_s17  }
  0x53   : > { %s373_s27 = sand.u32 1, %s2616_s19  }
  0x54   : > { %s1209_s30 = sshll.u32 %s373_s27, 3 }
  0x55   : > { %s375_s7 = scalar_lea.vmem [#allocation3], %s1209_s30 }
  0x56   : > { %1943 = dma.done.wait (%p2208_p9), %s372_s24, 128  }
  0x57   : > { %1945 = vsyncadd (%p2208_p9), %s372_s24, 4294967168 }
  0x58   : > { %1947 = dma.done.wait (%p71_p0), [#allocation7], 32  }
  0x59   : > { %1949 = vsyncadd (%p71_p0), [#allocation7], 4294967264  ;;  %s2618_s0 = sld [smem:[#allocation25_spill]] }
  0x5f   : > { %s388_s5 = sand.u32 1, %s2618_s0  }
  0x60   : > { %s1471_s25 = smul.u32 384, %s388_s5 }
  0x62   : > { %s2286_s11 = scalar_lea.vmem [#allocation8], %s1471_s25 }
  0x63   : > { %1951 = dma.done.wait (%p2152_p4), %s372_s24, 6144  }
  0x64   : > { %1953 = vsyncadd (%p2152_p4), %s372_s24, 4294961152 }
  0x65   : > { %1955 = dma.done.wait (%p71_p0), [#allocation7], 128  }
  0x66   : > { %1957 = vsyncadd (%p71_p0), [#allocation7], 4294967168 }
  0x67   : > { %1959 = dma.done.wait (%p71_p0), [#allocation11], 128  }
  0x68   : > { %1961 = vsyncadd (%p71_p0), [#allocation11], 4294967168  ;;  %s2620_s21 = sld [smem:[#allocation24_spill]] }
  0x69   : > { %s2621_s17 = sld [smem:[#allocation27_spill]] }
  0x6e   : > { %s2580_s1 = sand.u32 1, %s2620_s21  }
  0x6f   : > { %s2303_s18 = sshll.u32 %s2580_s1, 2  ;;  %p1216_p4 = scmp.ne.s32.totalorder %s2621_s17, 0 }
  0x70   : > { %s432_s8 = scalar_lea.vmem [#allocation12], %s2303_s18  ;;  %s439_s22 = scalar_lea.vmem [#allocation13], %s2303_s18 }
  0x71   : > { %s2579_s28 = scalar_lea.vmem [#allocation15], %s2303_s18  ;;  %450 = sbr.rel (%p1216_p4) target bundleno = 270 (0x10e), region = 64 }
  0x76   : > { %v451_v0 = vld [vmem:[%s375_s7] sm:$0xff]  ;;  %v2031_v6 = vmov 256.0   ;;  %v480_v16 = vld [vmem:[#allocation6] sm:$0x3] }
  0x77   : > { %v452_v1 = vunpack.c.l.bf16 %v451_v0  ;;  %v453_v2 = vunpack.c.h.bf16 %v451_v0  ;;  %1648 = vrcp.f32 %v2031_v6  ;;  %v481_v19 = vunpack.c.l.bf16 %v480_v16 }
  0x79   : > { %v454_v3 = vmul.f32 %v452_v1, %v452_v1  ;;  %v455_v4 = vmul.f32 %v453_v2, %v453_v2  ;;  %v483_v22 = vperm.slane %v481_v19, 0  ;;  %v484_v23 = vperm.slane %v481_v19, 2 }
  0x7b   : > { %v456_v5 = vadd.f32 %v455_v4, %v454_v3  ;;  %v487_v26 = vperm.slane %v483_v22, 0  ;;  %v488_v27 = vperm.slane %v484_v23, 0 }
  0x7d   : > { %457 = vadd.xlane.f32.xlu0 %v456_v5  ;;  %v1649_v7 = vpop.eup %1648 }
  0x7e   : > { %v460_v8 = vmul.f32 256.0, %v1649_v7  ;;  %vm464_vm0 = vweird.f32 %v1649_v7 }
  0x80   : > { %v461_v9 = vsub.f32 1.0, %v460_v8 }
  0x82   : > { %v462_v10 = vmul.f32 %v1649_v7, %v461_v9 }
  0x84   : > { %v463_v11 = vadd.f32 %v1649_v7, %v462_v10 }
  0x86   : > { %v465_v12 = vsel %vm464_vm0, %v1649_v7, %v463_v11 }
  0xf0   : > { %v458_v13 = vpop.xlane.xlu0 %457 }
  0xf1   : > { %v466_v14 = vmul.f32 %v465_v12, %v458_v13 }
  0xf3   : > { %v467_v15 = vadd.f32 1e-05, %v466_v14 }
  0xf5   : > { %1650 = vrsqrt.f32 %v467_v15  ;;  %vm474_vm2 = vweird.f32 %v467_v15 }
  0xfb   : > { %v1651_v17 = vpop.eup %1650 }
  0xfc   : > { %v469_v18 = vmul.f32 %v1651_v17, %v467_v15  ;;  %vm475_vm1 = vweird.f32 %v1651_v17 }
  0xfd   : > { %vm476_vm3 = vmor %vm474_vm2, %vm475_vm1 }
  0xfe   : > { %v470_v20 = vmul.f32 %v1651_v17, %v469_v18 }
 0x100   : > { %v471_v21 = vmul.f32 0.5, %v470_v20 }
 0x102   : > { %v472_v24 = vsub.f32 1.5, %v471_v21 }
 0x104   : > { %v473_v25 = vmul.f32 %v1651_v17, %v472_v24 }
 0x106   : > { %v477_v28 = vsel %vm476_vm3, %v1651_v17, %v473_v25 }
 0x107   : > { %v478_v29 = vmul.f32 %v477_v28, %v452_v1  ;;  %v479_v30 = vmul.f32 %v477_v28, %v453_v2 }
 0x109   : > { %v489_v31 = vmul.f32 %v487_v26, %v478_v29  ;;  %v490_v32 = vmul.f32 %v488_v27, %v479_v30 }
 0x10b   : > { %v491_v33 = vpack.c.bf16 %v490_v32, %v489_v31 }
 0x10d   : > { %492 = vst [vmem:[#allocation2] sm:$0xff] %v491_v33 }
 0x10e PF: > { %v1303_v34 = vld [vmem:[%s2286_s11 + $0xa8] sm:$0xf]  ;;  %v1443_v35 = vld [vmem:[%s2286_s11 + $0xb0] sm:$0xf0]  ;;  %v1442_v39 = vld [vmem:[%s2286_s11 + $0xac] sm:$0xf] }
 0x10f   : > { %v1399_v36 = vld [vmem:[%s2286_s11 + $0x168] sm:$0xf]  ;;  %v1304_v37 = vor.u32 %v1443_v35, %v1303_v34  ;;  %v1467_v38 = vld [vmem:[%s2286_s11 + $0x170] sm:$0xf0]  ;;  %v1305_v40 = vld [vmem:[%s2286_s11 + $0xb4] sm:$0xf0] }
 0x110   : > { %v1400_v41 = vor.u32 %v1467_v38, %v1399_v36  ;;  %v1308_v42 = vor.u32 %v1442_v39, %v1305_v40  ;;  %v1466_v43 = vld [vmem:[%s2286_s11 + $0x16c] sm:$0xf]  ;;  %v1401_v44 = vld [vmem:[%s2286_s11 + $0x174] sm:$0xf0]  ;;  %v1291_v45 = vld [vmem:[%s2286_s11 + $0x90] sm:$0xf] }
 0x111   : > { %821 = vmatpush.bf16.msra.mxu0 %v1304_v37  ;;  %v1404_v46 = vor.u32 %v1466_v43, %v1401_v44  ;;  %v1440_v47 = vld [vmem:[%s2286_s11 + $0x98] sm:$0xf0]  ;;  %v1387_v48 = vld [vmem:[%s2286_s11 + $0x150] sm:$0xf]  ;;  %v1439_v52 = vld [vmem:[%s2286_s11 + $0x94] sm:$0xf] }
 0x112   : > { %v1464_v49 = vld [vmem:[%s2286_s11 + $0x158] sm:$0xf0]  ;;  %834 = vmatpush.bf16.msra.mxu1 %v1400_v41  ;;  %847 = vmatpush.bf16.msra.mxu2 %v1308_v42  ;;  %v1292_v50 = vor.u32 %v1440_v47, %v1291_v45  ;;  %v1293_v53 = vld [vmem:[%s2286_s11 + $0x9c] sm:$0xf0]  ;;  %v1463_v54 = vld [vmem:[%s2286_s11 + $0x154] sm:$0xf] }
 0x113   : > { %v1388_v51 = vor.u32 %v1464_v49, %v1387_v48  ;;  %860 = vmatpush.bf16.msra.mxu3 %v1404_v46  ;;  %v1296_v55 = vor.u32 %v1439_v52, %v1293_v53  ;;  %v1389_v56 = vld [vmem:[%s2286_s11 + $0x15c] sm:$0xf0]  ;;  %v1279_v57 = vld [vmem:[%s2286_s11 + $0x78] sm:$0xf]  ;;  %v1437_v58 = vld [vmem:[%s2286_s11 + $0x80] sm:$0xf0] }
 0x114   : > { %v1392_v59 = vor.u32 %v1463_v54, %v1389_v56  ;;  %v1375_v60 = vld [vmem:[%s2286_s11 + $0x138] sm:$0xf]  ;;  %v1461_v61 = vld [vmem:[%s2286_s11 + $0x140] sm:$0xf0]  ;;  %v1436_v62 = vld [vmem:[%s2286_s11 + $0x7c] sm:$0xf]  ;;  %v1280_v63 = vor.u32 %v1437_v58, %v1279_v57 }
 0x115   : > { %822 = vmatpush.bf16.msra.mxu0 %v1292_v50  ;;  %v1281_v0 = vld [vmem:[%s2286_s11 + $0x84] sm:$0xf0]  ;;  %v1460_v1 = vld [vmem:[%s2286_s11 + $0x13c] sm:$0xf]  ;;  %v1376_v3 = vor.u32 %v1461_v61, %v1375_v60  ;;  %v1267_v5 = vld [vmem:[%s2286_s11 + $0x60] sm:$0xf] }
 0x116   : > { %v1377_v2 = vld [vmem:[%s2286_s11 + $0x144] sm:$0xf0]  ;;  %835 = vmatpush.bf16.msra.mxu1 %v1388_v51  ;;  %848 = vmatpush.bf16.msra.mxu2 %v1296_v55  ;;  %v1284_v4 = vor.u32 %v1436_v62, %v1281_v0  ;;  %v1434_v6 = vld [vmem:[%s2286_s11 + $0x68] sm:$0xf0]  ;;  %v1363_v7 = vld [vmem:[%s2286_s11 + $0x120] sm:$0xf] }
 0x117   : > { %861 = vmatpush.bf16.msra.mxu3 %v1392_v59  ;;  %v1380_v8 = vor.u32 %v1460_v1, %v1377_v2  ;;  %v1458_v9 = vld [vmem:[%s2286_s11 + $0x128] sm:$0xf0]  ;;  %v1433_v10 = vld [vmem:[%s2286_s11 + $0x64] sm:$0xf]  ;;  %v1269_v11 = vld [vmem:[%s2286_s11 + $0x6c] sm:$0xf0]  ;;  %v1268_v14 = vor.u32 %v1434_v6, %v1267_v5 }
 0x118   : > { %v1457_v12 = vld [vmem:[%s2286_s11 + $0x124] sm:$0xf]  ;;  %v1365_v13 = vld [vmem:[%s2286_s11 + $0x12c] sm:$0xf0]  ;;  %v1364_v15 = vor.u32 %v1458_v9, %v1363_v7  ;;  %v1272_v16 = vor.u32 %v1433_v10, %v1269_v11  ;;  %v1255_v17 = vld [vmem:[%s2286_s11 + $0x48] sm:$0xf] }
 0x119   : > { %823 = vmatpush.bf16.msra.mxu0 %v1280_v63  ;;  %v1431_v18 = vld [vmem:[%s2286_s11 + $0x50] sm:$0xf0]  ;;  %v1351_v19 = vld [vmem:[%s2286_s11 + $0x108] sm:$0xf]  ;;  %v1368_v20 = vor.u32 %v1457_v12, %v1365_v13  ;;  %v1430_v22 = vld [vmem:[%s2286_s11 + $0x4c] sm:$0xf] }
 0x11a   : > { %836 = vmatpush.bf16.msra.mxu1 %v1376_v3  ;;  %849 = vmatpush.bf16.msra.mxu2 %v1284_v4  ;;  %v1455_v21 = vld [vmem:[%s2286_s11 + $0x110] sm:$0xf0]  ;;  %v1257_v23 = vld [vmem:[%s2286_s11 + $0x54] sm:$0xf0]  ;;  %v1454_v24 = vld [vmem:[%s2286_s11 + $0x10c] sm:$0xf]  ;;  %v1256_v26 = vor.u32 %v1431_v18, %v1255_v17 }
 0x11b   : > { %862 = vmatpush.bf16.msra.mxu3 %v1380_v8  ;;  %v1353_v25 = vld [vmem:[%s2286_s11 + $0x114] sm:$0xf0]  ;;  %v1352_v27 = vor.u32 %v1455_v21, %v1351_v19  ;;  %v1260_v28 = vor.u32 %v1430_v22, %v1257_v23  ;;  %v1243_v29 = vld [vmem:[%s2286_s11 + $0x30] sm:$0xf]  ;;  %v1428_v30 = vld [vmem:[%s2286_s11 + $0x38] sm:$0xf0] }
 0x11c   : > { %v1339_v31 = vld [vmem:[%s2286_s11 + $0xf0] sm:$0xf]  ;;  %v1356_v32 = vor.u32 %v1454_v24, %v1353_v25  ;;  %v1452_v33 = vld [vmem:[%s2286_s11 + $0xf8] sm:$0xf0]  ;;  %v1427_v34 = vld [vmem:[%s2286_s11 + $0x34] sm:$0xf]  ;;  %v1244_v38 = vor.u32 %v1428_v30, %v1243_v29 }
 0x11d   : > { %824 = vmatpush.bf16.msra.mxu0 %v1268_v14  ;;  %v1245_v35 = vld [vmem:[%s2286_s11 + $0x3c] sm:$0xf0]  ;;  %v1451_v36 = vld [vmem:[%s2286_s11 + $0xf4] sm:$0xf]  ;;  %v1340_v39 = vor.u32 %v1452_v33, %v1339_v31  ;;  %v1231_v41 = vld [vmem:[%s2286_s11 + $0x18] sm:$0xf] }
 0x11e   : > { %837 = vmatpush.bf16.msra.mxu1 %v1364_v15  ;;  %850 = vmatpush.bf16.msra.mxu2 %v1272_v16  ;;  %v1341_v37 = vld [vmem:[%s2286_s11 + $0xfc] sm:$0xf0]  ;;  %v1248_v40 = vor.u32 %v1427_v34, %v1245_v35  ;;  %v1425_v42 = vld [vmem:[%s2286_s11 + $0x20] sm:$0xf0]  ;;  %v1327_v43 = vld [vmem:[%s2286_s11 + $0xd8] sm:$0xf] }
 0x11f   : > { %863 = vmatpush.bf16.msra.mxu3 %v1368_v20  ;;  %v1344_v44 = vor.u32 %v1451_v36, %v1341_v37  ;;  %v1449_v45 = vld [vmem:[%s2286_s11 + $0xe0] sm:$0xf0]  ;;  %v1424_v46 = vld [vmem:[%s2286_s11 + $0x1c] sm:$0xf]  ;;  %v1233_v47 = vld [vmem:[%s2286_s11 + $0x24] sm:$0xf0]  ;;  %v1232_v50 = vor.u32 %v1425_v42, %v1231_v41 }
 0x120   : > { %v1448_v48 = vld [vmem:[%s2286_s11 + $0xdc] sm:$0xf]  ;;  %v1329_v49 = vld [vmem:[%s2286_s11 + $0xe4] sm:$0xf0]  ;;  %v1219_v51 = vld [vmem:[%s2286_s11] sm:$0xf]  ;;  %v1328_v53 = vor.u32 %v1449_v45, %v1327_v43  ;;  %v1236_v54 = vor.u32 %v1424_v46, %v1233_v47 }
 0x121   : > { %825 = vmatpush.bf16.msra.mxu0 %v1256_v26  ;;  %v493_v52 = vld [vmem:[#allocation2] sm:$0xff]  ;;  %v1315_v56 = vld [vmem:[%s2286_s11 + $0xc0] sm:$0xf]  ;;  %v1332_v58 = vor.u32 %v1448_v48, %v1329_v49  ;;  %v1221_v60 = vld [vmem:[%s2286_s11 + $0xc] sm:$0xf0]  ;;  %s2032_s19 = smov 64  }
 0x122   : > { %838 = vmatpush.bf16.msra.mxu1 %v1352_v27  ;;  %851 = vmatpush.bf16.msra.mxu2 %v1260_v28  ;;  %v1422_v55 = vld [vmem:[%s2286_s11 + $0x8] sm:$0xf0]  ;;  %v1421_v59 = vld [vmem:[%s2286_s11 + $0x4] sm:$0xf]  ;;  %v1317_v62 = vld [vmem:[%s2286_s11 + $0xcc] sm:$0xf0]  ;;  %v559_v63 = vunpack.c.l.b16 %v493_v52  ;;  %v560_v3 = vunpack.c.h.b16 %v493_v52 }
 0x123   : > { %864 = vmatpush.bf16.msra.mxu3 %v1356_v32  ;;  %v1446_v57 = vld [vmem:[%s2286_s11 + $0xc8] sm:$0xf0]  ;;  %v1445_v61 = vld [vmem:[%s2286_s11 + $0xc4] sm:$0xf]  ;;  %v1311_v0 = vld [vmem:[%s2286_s11 + $0xb0] sm:$0xf]  ;;  %v1220_v2 = vor.u32 %v1422_v55, %v1219_v51  ;;  %v1224_v7 = vor.u32 %v1421_v59, %v1221_v60 }
 0x124   : > { %v1444_v1 = vld [vmem:[%s2286_s11 + $0xb8] sm:$0xf0]  ;;  %v1407_v4 = vld [vmem:[%s2286_s11 + $0x170] sm:$0xf]  ;;  %v1316_v6 = vor.u32 %v1446_v57, %v1315_v56  ;;  %v1320_v8 = vor.u32 %v1445_v61, %v1317_v62  ;;  %v2377_v10 = vpack.c.b16 %v559_v63, %v559_v63  ;;  %v1299_v12 = vld [vmem:[%s2286_s11 + $0x98] sm:$0xf]  ;;  %v2381_v14 = vpack.c.b16 %v560_v3, %v560_v3 }
 0x125   : > { %826 = vmatpush.bf16.msra.mxu0 %v1244_v38  ;;  %v1468_v5 = vld [vmem:[%s2286_s11 + $0x178] sm:$0xf0]  ;;  %v1312_v9 = vor.u32 %v1444_v1, %v1311_v0  ;;  %v1441_v13 = vld [vmem:[%s2286_s11 + $0xa0] sm:$0xf0]  ;;  %v1395_v15 = vld [vmem:[%s2286_s11 + $0x158] sm:$0xf] }
 0x126   : > { %839 = vmatpush.bf16.msra.mxu1 %v1340_v39  ;;  %852 = vmatpush.bf16.msra.mxu2 %v1248_v40  ;;  %v1408_v11 = vor.u32 %v1468_v5, %v1407_v4  ;;  %v1465_v16 = vld [vmem:[%s2286_s11 + $0x160] sm:$0xf0]  ;;  %v1300_v17 = vor.u32 %v1441_v13, %v1299_v12  ;;  %v1287_v19 = vld [vmem:[%s2286_s11 + $0x80] sm:$0xf]  ;;  %v1438_v20 = vld [vmem:[%s2286_s11 + $0x88] sm:$0xf0] }
 0x127   : > { %865 = vmatpush.bf16.msra.mxu3 %v1344_v44  ;;  %v1396_v18 = vor.u32 %v1465_v16, %v1395_v15  ;;  %v1383_v21 = vld [vmem:[%s2286_s11 + $0x140] sm:$0xf]  ;;  %v1462_v22 = vld [vmem:[%s2286_s11 + $0x148] sm:$0xf0]  ;;  %v1288_v23 = vor.u32 %v1438_v20, %v1287_v19  ;;  %v1275_v25 = vld [vmem:[%s2286_s11 + $0x68] sm:$0xf] }
 0x128   : > { %v1384_v24 = vor.u32 %v1462_v22, %v1383_v21  ;;  %v1435_v26 = vld [vmem:[%s2286_s11 + $0x70] sm:$0xf0]  ;;  %v1371_v27 = vld [vmem:[%s2286_s11 + $0x128] sm:$0xf]  ;;  %v1263_v31 = vld [vmem:[%s2286_s11 + $0x50] sm:$0xf] }
 0x129   : > { %827 = vmatpush.bf16.msra.mxu0 %v1232_v50  ;;  %v1459_v28 = vld [vmem:[%s2286_s11 + $0x130] sm:$0xf0]  ;;  %v1276_v29 = vor.u32 %v1435_v26, %v1275_v25  ;;  %v1432_v32 = vld [vmem:[%s2286_s11 + $0x58] sm:$0xf0]  ;;  %v1359_v33 = vld [vmem:[%s2286_s11 + $0x110] sm:$0xf] }
 0x12a   : > { %840 = vmatpush.bf16.msra.mxu1 %v1328_v53  ;;  %853 = vmatpush.bf16.msra.mxu2 %v1236_v54  ;;  %v1372_v30 = vor.u32 %v1459_v28, %v1371_v27  ;;  %v1456_v34 = vld [vmem:[%s2286_s11 + $0x118] sm:$0xf0]  ;;  %v1264_v35 = vor.u32 %v1432_v32, %v1263_v31  ;;  %v1251_v37 = vld [vmem:[%s2286_s11 + $0x38] sm:$0xf]  ;;  %v1429_v38 = vld [vmem:[%s2286_s11 + $0x40] sm:$0xf0] }
 0x12b   : > { %866 = vmatpush.bf16.msra.mxu3 %v1332_v58  ;;  %v1360_v36 = vor.u32 %v1456_v34, %v1359_v33  ;;  %v1347_v39 = vld [vmem:[%s2286_s11 + $0xf8] sm:$0xf]  ;;  %v1453_v40 = vld [vmem:[%s2286_s11 + $0x100] sm:$0xf0]  ;;  %v1252_v41 = vor.u32 %v1429_v38, %v1251_v37  ;;  %v1239_v43 = vld [vmem:[%s2286_s11 + $0x20] sm:$0xf] }
 0x12c   : > { %v1348_v42 = vor.u32 %v1453_v40, %v1347_v39  ;;  %v1426_v44 = vld [vmem:[%s2286_s11 + $0x28] sm:$0xf0]  ;;  %v1335_v45 = vld [vmem:[%s2286_s11 + $0xe0] sm:$0xf]  ;;  %v1227_v49 = vld [vmem:[%s2286_s11 + $0x8] sm:$0xf] }
 0x12d   : > { %828 = vmatpush.bf16.msra.mxu0 %v1220_v2  ;;  %v1450_v46 = vld [vmem:[%s2286_s11 + $0xe8] sm:$0xf0]  ;;  %v1240_v47 = vor.u32 %v1426_v44, %v1239_v43  ;;  %v1423_v50 = vld [vmem:[%s2286_s11 + $0x10] sm:$0xf0]  ;;  %v1323_v51 = vld [vmem:[%s2286_s11 + $0xc8] sm:$0xf] }
 0x12e   : > { %841 = vmatpush.bf16.msra.mxu1 %v1316_v6  ;;  %854 = vmatpush.bf16.msra.mxu2 %v1224_v7  ;;  %v1336_v48 = vor.u32 %v1450_v46, %v1335_v45  ;;  %v1447_v52 = vld [vmem:[%s2286_s11 + $0xd0] sm:$0xf0]  ;;  %v1228_v53 = vor.u32 %v1423_v50, %v1227_v49  ;;  %s2622_s16 = sld [smem:[#allocation28_spill]]  ;;  %v899_v7 = vld [vmem:[#allocation9] sm:$0xff]  ;;  %s2427_s21 = sshll.u32 %s432_s8, 4  ;;  %s949_s21 = int_to_ptr.vmem [resolvable:$true] %s2427_s21 }
 0x12f   : > { %867 = vmatpush.bf16.msra.mxu3 %v1320_v8  ;;  %v1324_v54 = vor.u32 %v1447_v52, %v1323_v51  ;;  %s2623_s27 = sld [smem:[#allocation27_spill]]  ;;  %v900_v8 = vld [vmem:[#allocation10] sm:$0xff] }
 0x130   : > { %829 = vmatmul.bf16.vlgmr.msra.gmra.mxu0 %v2377_v10  ;;  %s2624_s5 = sld [smem:[#allocation41_spill]] }
 0x131   : > { %873 = vmatpush.bf16.msrb.mxu0 %v1312_v9  ;;  %842 = vmatmul.bf16.vlgmr.msra.gmra.mxu1 %v2381_v14  ;;  %s2625_s11 = sld [smem:[#allocation24_spill]] }
 0x132   : > { %886 = vmatpush.bf16.msrb.mxu1 %v1408_v11  ;;  %855 = vmatmul.bf16.vlgmr.msra.gmra.mxu2 %v2377_v10  ;;  %s2629_s20 = sld [smem:[#allocation43_spill]] }
 0x133   : > { %868 = vmatmul.bf16.vlgmr.msra.gmra.mxu3 %v2381_v14 }
 0x134   : > { %s1412_s30 = sshll.u32 %s2622_s16, 1 }
 0x135   : > { %874 = vmatpush.bf16.msrb.mxu0 %v1300_v17  ;;  %s944_s24 = sadd.s32 %s2623_s27, %s1412_s30  ;;  %s2626_s27 = sld [smem:[#allocation42_spill]] }
 0x136   : > { %887 = vmatpush.bf16.msrb.mxu1 %v1396_v18  ;;  %s2419_s7 = sshll.u32 %s944_s24, 2  ;;  %s1822_s0 = scalar_lea.hbm %s2624_s5, 16 }
 0x137   : > { %s946_s25 = scalar_lea.hbm %s2624_s5, %s2419_s7 }
 0x138   : > { %s950_s17 = sshll.u32 %s946_s25, 4  ;;  %s980_s1 = scalar_lea.hbm %s2629_s20, %s2419_s7  ;;  %s951_s17 = int_to_ptr.hbm [resolvable:$true] %s950_s17 }
 0x139   : > { %875 = vmatpush.bf16.msrb.mxu0 %v1288_v23  ;;  %s2442_s25 = sshll.u32 %s439_s22, 4  ;;  %s966_s25 = int_to_ptr.vmem [resolvable:$true] %s2442_s25 }
 0x13a   : > { %888 = vmatpush.bf16.msrb.mxu1 %v1384_v24 }
 0x13b   : > { %s2627_s23 = smov %s2626_s27  ;;  %s963_s30 = scalar_lea.hbm %s2626_s27, %s2419_s7 }
 0x13c   : > { %s2444_s2 = sshll.u32 %s963_s30, 4  ;;  %s1816_s27 = sshra.s32 %s951_s17, 4  ;;  %s1817_s27 = int_to_ptr.hbm [resolvable:$true] %s1816_s27  ;;  %s968_s2 = int_to_ptr.hbm [resolvable:$true] %s2444_s2 }
 0x13d   : > { %876 = vmatpush.bf16.msrb.mxu0 %v1276_v29  ;;  %s1818_s3 = scalar_lea.hbm %s1817_s27, 4  ;;  %p1823_p13 = scmp.lt.s32.totalorder %s1817_s27, %s2624_s5 }
 0x13e   : > { %889 = vmatpush.bf16.msrb.mxu1 %v1372_v30  ;;  %p1819_p0 = scmp.ne.s32.totalorder %s1817_s27, %s1818_s3  ;;  %p1824_p5 = scmp.lt.s32.totalorder %s1822_s0, %s1818_s3 }
 0x140   : > { %p1820_p10 = pnand %p1819_p0, %p2158_p6  ;;  %p1825_p9 = por %p1824_p5, %p1823_p13 }
 0x141   : > { %877 = vmatpush.bf16.msrb.mxu0 %v1264_v35 }
 0x142   : > { %890 = vmatpush.bf16.msrb.mxu1 %v1360_v36  ;;  %p1821_p11 = pneg %p1820_p10 }
 0x144   : > { %p1826_p1 = pnand %p1825_p9, %p1821_p11 }
 0x145   : > { %878 = vmatpush.bf16.msrb.mxu0 %v1252_v41 }
 0x146   : > { %891 = vmatpush.bf16.msrb.mxu1 %v1348_v42 }
 0x149   : > { %879 = vmatpush.bf16.msrb.mxu0 %v1240_v47 }
 0x14a   : > { %892 = vmatpush.bf16.msrb.mxu1 %v1336_v48 }
 0x14d   : > { %880 = vmatpush.bf16.msrb.mxu0 %v1228_v53 }
 0x14e   : > { %893 = vmatpush.bf16.msrb.mxu1 %v1324_v54 }
 0x150   : > { %881 = vmatmul.bf16.vlgmr.msrb.gmra.mxu0 %v2377_v10 }
 0x151   : > { %894 = vmatmul.bf16.vlgmr.msrb.gmra.mxu1 %v2381_v14 }
 0x1ad   : > { %v830_v55 = vpop.f32.mrf.mxu0 }
 0x1ae   : > { %v843_v56 = vpop.f32.mrf.mxu1 }
 0x1af   : > { %v844_v57 = vadd.f32 %v843_v56, %v830_v55 }
 0x1b1   : > { %902 = vrot.lane.b32.xlu0 %v844_v57, %s2032_s19  ;;  %v905_v10 = vmul.f32 %v899_v7, %v844_v57 }
 0x1b5   : > { %v856_v58 = vpop.f32.mrf.mxu2  ;;  %v832_v60 = vpop.f32.mrf.mxu0 }
 0x1b6   : > { %v869_v59 = vpop.f32.mrf.mxu3  ;;  %v845_v62 = vpop.f32.mrf.mxu1 }
 0x1b7   : > { %v870_v61 = vadd.f32 %v869_v59, %v856_v58 }
 0x1b9   : > { %912 = vrot.lane.b32.xlu0 %v870_v61, %s2032_s19  ;;  %v915_v16 = vmul.f32 %v899_v7, %v870_v61  ;;  %s2630_s19 = sand.u32 1, %s2625_s11  }
 0x1ba   : > { %s923_s16 = scalar_lea.sflag [#allocation5], %s2630_s19 }
 0x1bd   : > { %v858_v63 = vpop.f32.mrf.mxu2 }
 0x1be   : > { %v871_v0 = vpop.f32.mrf.mxu3 }
 0x1cd   : > { %v882_v1 = vpop.f32.mrf.mxu0 }
 0x1ce   : > { %v895_v2 = vpop.f32.mrf.mxu1 }
 0x1cf   : > { %v896_v3 = vadd.f32 %v895_v2, %v882_v1 }
 0x1d1   : > { %v920_v6 = vpack.c.bf16 %v896_v3, %v896_v3 }
 0x1d3   : > { %921 = vst [vmem:[%s2579_s28] sm:$0xf] %v920_v6 }
 0x1d5   : > { %v884_v4 = vpop.f32.mrf.mxu0 }
 0x1d6   : > { %v897_v5 = vpop.f32.mrf.mxu1 }
 0x223   : > { %v903_v9 = vpop.permute.xlu0 %902 }
 0x224   : > { %v906_v11 = vmul.f32 %v903_v9, %v900_v8 }
 0x226   : > { %v907_v12 = vadd.f32 %v906_v11, %v905_v10 }
 0x228   : > { %v908_v13 = vmul.f32 0.088388346, %v907_v12 }
 0x22a   : > { %v909_v14 = vpack.c.bf16 %v908_v13, %v908_v13 }
 0x22b   : > { %v913_v15 = vpop.permute.xlu0 %912 }
 0x22c   : > { %910 = vst [vmem:[%s432_s8] sm:$0xf] %v909_v14  ;;  %v916_v17 = vmul.f32 %v913_v15, %v900_v8 }
 0x22d   : > { %1829 = shalt.err (!%p1826_p1)
}
 0x22e   : > { %1488 = dma.vmem_to_hbm [thread:$0]  (%p2158_p6), %s949_s21, 64, %s951_s17, %s923_s16   ;;  %v917_v18 = vadd.f32 %v916_v17, %v915_v16 }
 0x22f   : > { %s2631_s11 = scalar_lea.vmem [#allocation15], %s2303_s18  ;;  %s2462_s4 = sshll.u32 %s980_s1, 4  ;;  %s985_s4 = int_to_ptr.hbm [resolvable:$true] %s2462_s4 }
 0x230   : > { %s2460_s30 = sshll.u32 %s2631_s11, 4  ;;  %v918_v19 = vpack.c.bf16 %v917_v18, %v917_v18  ;;  %s2632_s3 = sand.u32 1, %s2142_s15   ;;  %s983_s30 = int_to_ptr.vmem [resolvable:$true] %s2460_s30 }
 0x231   : > { %s928_s19 = scalar_lea.sflag [#allocation14], %s2632_s3  ;;  %s1844_s27 = sshra.s32 %s968_s2, 4  ;;  %s1845_s27 = int_to_ptr.hbm [resolvable:$true] %s1844_s27 }
 0x232   : > { %919 = vst [vmem:[%s439_s22] sm:$0xf] %v918_v19  ;;  %s1846_s21 = scalar_lea.hbm %s1845_s27, 4  ;;  %s1850_s16 = scalar_lea.hbm %s2627_s23, 16 }
 0x233   : > { %p1847_p2 = scmp.ne.s32.totalorder %s1845_s27, %s1846_s21  ;;  %p1851_p3 = scmp.lt.s32.totalorder %s1845_s27, %s2627_s23 }
 0x234   : > { %p1852_p12 = scmp.lt.s32.totalorder %s1850_s16, %s1846_s21 }
 0x235   : > { %p1848_p7 = pnand %p1847_p2, %p2158_p6 }
 0x236   : > { %p1853_p4 = por %p1852_p12, %p1851_p3 }
 0x237   : > { %p1849_p8 = pneg %p1848_p7 }
 0x239   : > { %p1854_p0 = pnand %p1853_p4, %p1849_p8 }
 0x23b   : > { %1857 = shalt.err (!%p1854_p0)
}
 0x23c   : > { %1489 = dma.vmem_to_hbm [thread:$0]  (%p2158_p6), %s966_s25, 64, %s968_s2, %s928_s19  }
 0x23d   : > { %s1872_s15 = sshra.s32 %s985_s4, 4  ;;  %s1878_s8 = scalar_lea.hbm %s2629_s20, 16  ;;  %s1873_s15 = int_to_ptr.hbm [resolvable:$true] %s1872_s15 }
 0x23e   : > { %s1874_s18 = scalar_lea.hbm %s1873_s15, 4  ;;  %p1879_p5 = scmp.lt.s32.totalorder %s1873_s15, %s2629_s20 }
 0x23f   : > { %p1875_p10 = scmp.ne.s32.totalorder %s1873_s15, %s1874_s18  ;;  %p1880_p9 = scmp.lt.s32.totalorder %s1878_s8, %s1874_s18 }
 0x241   : > { %p1876_p11 = pnand %p1875_p10, %p2158_p6  ;;  %p1881_p1 = por %p1880_p9, %p1879_p5 }
 0x243   : > { %p1877_p13 = pneg %p1876_p11 }
 0x245   : > { %p1882_p2 = pnand %p1881_p1, %p1877_p13 }
 0x247   : > { %1885 = shalt.err (!%p1882_p2)
}
 0x248   : > { %1490 = dma.vmem_to_hbm [thread:$0]  (%p2158_p6), %s983_s30, 64, %s985_s4, %s928_s19  }
 0x249 PF: > { %s2633_s2 = sld [smem:[#allocation23_spill]]  ;;  %p1528_p7 = scmp.ge.s32.totalorder %s2024_s14, 2 }
 0x24a   : > { %s2634_s25 = sld [smem:[#allocation31_spill]] }
 0x24f   : > { %s996_s27 = sand.u32 1, %s2633_s2  }
 0x250   : > { %p2635_p8 = scmp.ne.s32.totalorder %s2634_s25, 0  ;;  %s997_s21 = scalar_lea.sflag [#allocation5], %s996_s27 }
 0x252   : > { %p1512_p3 = pnand %p1528_p7, %p2635_p8 }
 0x254   : > { %p1513_p12 = pneg %p1512_p3 }
 0x256   : > { %1963 = dma.done.wait (%p1513_p12), %s997_s21, 64  }
 0x257   : > { %1965 = vsyncadd (%p1513_p12), %s997_s21, 4294967232  ;;  %s2636_s17 = sadd.s32 4294967294, %s2024_s14  }
 0x258   : > { %s1006_s24 = sand.u32 1, %s2636_s17  }
 0x259   : > { %s1007_s1 = scalar_lea.sflag [#allocation14], %s1006_s24 }
 0x25a   : > { %1967 = dma.done.wait (%p1513_p12), %s1007_s1, 128  }
 0x25b   : > { %1969 = vsyncadd (%p1513_p12), %s1007_s1, 4294967168  ;;  %s29_s14 = sadd.s32 1, %s2024_s14   ;;  %s2638_s24 = sld [smem:[#allocation24_spill]] }
 0x25c   : > { %p2505_p6 = scmp.ge.s32.totalorder %s29_s14, 6   ;;  %s2639_s27 = sld [smem:[#allocation25_spill]] }
 0x25d   : > { %s2640_s4 = sld [smem:[#allocation35_spill]]  ;;  %s2645_s25 = smov %s1980_s26 }
 0x25e   : > { %s2641_s19 = sld [smem:[#allocation26_spill]]  ;;  %s2646_s26 = smov %s2236_s10 }
 0x25f   : > { %s2642_s16 = sld [smem:[#allocation32_spill]]  ;;  %s2647_s28 = smov %s1992_s29 }
 0x260   : > { %s2643_s7 = sld [smem:[#allocation34_spill]]  ;;  %s2650_s8 = smov %s2004_s9 }
 0x261   : > { %s2651_s9 = smov %s2230_s6  ;;  %s2652_s10 = smov %s2016_s12 }
 0x262   : > { %s2653_s11 = smov %s2020_s13  ;;  %28 = sbr.rel (!%p2505_p6) target bundleno = 23 (0x17), region = 146 }
 0x263   : > { %s2648_s29 = smov %s2640_s4 }
 0x264   : > { %s2649_s30 = smov %s2641_s19 }
 0x265   : > { %s2654_s12 = smov %s2642_s16 }
 0x266   : > { %s2655_s13 = smov %s2643_s7 }
 0x267   :  { %1023 = vsyncpa [#allocation4], 1 }
 0x268   :  { %1025 = vsyncpa [#allocation4 + $0x1], 1 }
 0x269   :  { %1026 = vsyncpa [#allocation7], 1 }
 0x26a   :  { %1027 = vsyncpa [#allocation11], 1 }
 0x26b   :  { %1028 = vsyncpa [#allocation5], 1 }
 0x26c   :  { %1030 = vsyncpa [#allocation5 + $0x1], 1 }
 0x26d   :  { %1031 = vsyncpa [#allocation14], 1 }
 0x26e   :  { %1033 = vsyncpa [#allocation14 + $0x1], 1 }

</bundles_post_ra>
